<compile_context>
chip_gen: v5e
topology: v5e:2x2
jax: 0.10.0
libtpu: 0.0.40
codegen_flags: <defaults>
</compile_context>

<pallas_src>
import functools

import jax
import jax.numpy as jnp
from jax.experimental import pallas as pl
from jax.experimental.pallas import tpu as pltpu

BETA = 0.1        # subclass pins lif1.beta = 0.1
THRESHOLD = 1.0   # snn.Leaky default


def _round_up(n: int, m: int) -> int:
    return (n + m - 1) // m * m


def _choose_tile_b(B: int, T: int, I: int, itemsize: int):
    """Pick a batch tile so the double-buffered x block stays <= ~16 MB (v7x-safe)."""
    target_x_block_bytes = 8 * 1024 * 1024
    rows = max(1, target_x_block_bytes // (T * I * itemsize))
    if B <= rows:
        return B, B                          # single block spanning the full batch
    tile_b = max(8, (rows // 8) * 8)         # multiple of 8 for sublane alignment
    return tile_b, _round_up(B, tile_b)


def _leaky_one_layer_kernel(x_ref, w_ref, b_ref, out_ref, *, num_outputs):
    """One batch tile of the full forward.

    x_ref  : (T, TILE_B, I)   time-major input tile (contiguous per-t slabs)
    w_ref  : (I, O_pad)       fc1 weight, pre-transposed + lane-padded (VMEM-resident)
    b_ref  : (1, O_pad)       fc1 bias, lane-padded (VMEM-resident)
    out_ref: (TILE_B, O_pad)  softmax over the first num_outputs lanes
    """
    T, tile_b, I = x_ref.shape
    o_pad = w_ref.shape[1]

    # --- fc1 hoisted out of the time loop: one MXU matmul over all T*TILE_B rows.
    x2d = x_ref[...].reshape(T * tile_b, I)
    cur_all = (jnp.dot(x2d, w_ref[...], preferred_element_type=jnp.float32)
               + b_ref[...].astype(jnp.float32))
    cur_all = cur_all.reshape(T, tile_b, o_pad)      # time-major: cur_all[t] contiguous

    # --- Leaky (subtract-reset, reset_delay) recurrence + spike accumulation.
    #     Pure VPU, f32, fully unrolled (T is small & static).
    mem = jnp.zeros((tile_b, o_pad), jnp.float32)
    acc = jnp.zeros((tile_b, o_pad), jnp.float32)
    for t in range(T):
        cur = cur_all[t]
        reset = (mem > THRESHOLD).astype(jnp.float32)
        mem = BETA * mem + cur - reset * THRESHOLD
        spk = (mem > THRESHOLD).astype(jnp.float32)
        acc = acc + spk

    # --- softmax over the real lanes. acc in [0, T]; pad lanes of acc are exactly 0
    #     (zero weight/bias pad lanes can never spike), so only lane-masking is needed.
    lane = jax.lax.broadcasted_iota(jnp.int32, (tile_b, o_pad), 1)
    valid = lane < num_outputs
    if T <= 80:
        # exp(acc) <= exp(T) is finite in f32 -> skip max-subtraction
        # (one fewer XLU reduction + VPU subtract).
        e = jnp.where(valid, jnp.exp(acc), 0.0)
    else:
        m = jnp.max(jnp.where(valid, acc, 0.0), axis=-1, keepdims=True)
        e = jnp.where(valid, jnp.exp(acc - m), 0.0)
    denom = jnp.sum(e, axis=-1, keepdims=True)
    # NOTE: approx reciprocal (EUP) -> rows sum to 1 within ~2^-12 relative.
    out_ref[...] = e * pl.reciprocal(denom, approx=True)


def prepare_params(w1, b1, compute_dtype=jnp.float32):
    """One-time (per weight update) prep: transpose to (I, O) and lane-pad to a
    multiple of 128. Cache the result across forwards in the evolution loop --
    rebuilding it per call costs about as much HBM traffic as the kernel itself
    at tiny batch sizes. compute_dtype=jnp.bfloat16 halves weight/x DMA (v6e/v7x
    native MXU path) but may flip spikes whose membrane lands near threshold."""
    O, I = w1.shape
    O_pad = _round_up(max(O, 128), 128)
    w_pad = jnp.zeros((I, O_pad), compute_dtype).at[:, :O].set(
        jnp.transpose(w1).astype(compute_dtype))
    b_pad = jnp.zeros((1, O_pad), jnp.float32).at[:, :O].set(
        b1.reshape(1, O).astype(jnp.float32))
    return w_pad, b_pad


@functools.partial(jax.jit, static_argnames=("num_outputs", "tile_b"))
def leaky_one_layer_forward(x_btI, w_pad, b_pad, *, num_outputs, tile_b=None):
    """x_btI: (B, T, num_inputs).  w_pad/b_pad: from prepare_params().
    Returns softmax probabilities (B, num_outputs)."""
    B, T, I = x_btI.shape
    I_w, O_pad = w_pad.shape
    assert I_w == I, "weight/input feature mismatch"

    itemsize = jnp.dtype(w_pad.dtype).itemsize
    if tile_b is None:
        tile_b, b_padded = _choose_tile_b(B, T, I, itemsize)
    else:
        b_padded = _round_up(B, tile_b)
    nb = b_padded // tile_b

    # Time-major layout so each per-timestep slab in the kernel is a contiguous
    # sublane-aligned view; cast x to the compute dtype of the prepared weights.
    x_tm = jnp.transpose(x_btI, (1, 0, 2)).astype(w_pad.dtype)      # (T, B, I)
    if b_padded != B:
        x_tm = jnp.pad(x_tm, ((0, 0), (0, b_padded - B), (0, 0)))

    # Per-block VMEM footprint (double-buffered x/out, resident weights, temporaries).
    block_bytes = (2 * T * tile_b * I * itemsize
                   + I * O_pad * itemsize
                   + O_pad * 4
                   + 2 * tile_b * O_pad * 4
                   + (T + 6) * tile_b * O_pad * 4)
    vmem_limit = int(min(max(2 * block_bytes, 32 * 1024 * 1024), 56 * 1024 * 1024))

    flops = 2 * b_padded * T * I * O_pad + 8 * b_padded * T * O_pad
    bytes_accessed = (x_tm.size * itemsize
                      + w_pad.size * itemsize
                      + b_pad.size * 4
                      + b_padded * O_pad * 4)

    out_pad = pl.pallas_call(
        functools.partial(_leaky_one_layer_kernel, num_outputs=num_outputs),
        out_shape=jax.ShapeDtypeStruct((b_padded, O_pad), jnp.float32),
        grid=(nb,),
        in_specs=[
            pl.BlockSpec((T, tile_b, I), lambda i: (0, i, 0)),   # x tile (pipelined)
            pl.BlockSpec((I, O_pad), lambda i: (0, 0)),          # W (VMEM-resident)
            pl.BlockSpec((1, O_pad), lambda i: (0, 0)),          # b (VMEM-resident)
        ],
        out_specs=pl.BlockSpec((tile_b, O_pad), lambda i: (i, 0)),
        compiler_params=pltpu.CompilerParams(
            dimension_semantics=("parallel",),       # v7x: shard blocks over both TCs
            vmem_limit_bytes=vmem_limit),
        cost_estimate=pl.CostEstimate(
            flops=flops,
            transcendentals=b_padded * O_pad,
            bytes_accessed=bytes_accessed),
    )(x_tm, w_pad, b_pad)

    return out_pad[:B, :num_outputs]


def _reference_forward(x_btI, w1, b1):
    """Pure-JAX reference mirroring the PyTorch/snntorch forward."""
    B, T, I = x_btI.shape
    O = w1.shape[0]
    mem = jnp.zeros((B, O), jnp.float32)
    acc = jnp.zeros((B, O), jnp.float32)
    for step in range(T):
        cur = x_btI[:, step, :] @ w1.T + b1
        reset = (mem > THRESHOLD).astype(jnp.float32)
        mem = BETA * mem + cur - reset * THRESHOLD
        spk = (mem > THRESHOLD).astype(jnp.float32)
        acc = acc + spk
    return jax.nn.softmax(acc, axis=1)


if __name__ == "__main__":
    # Module defaults: num_inputs = 28*28 = 784, num_outputs = 10.  Small B/T.
    NUM_INPUTS, NUM_OUTPUTS = 28 * 28, 10
    key = jax.random.PRNGKey(0)
    kx, kw, kb, kx2 = jax.random.split(key, 4)

    # Deterministic inputs on a coarse dyadic grid so the hoisted matmul and the
    # per-step reference matmul are bit-identical (no spurious spike flips at the
    # hard threshold from matmul rounding differences).
    w1 = jax.random.randint(kw, (NUM_OUTPUTS, NUM_INPUTS), -2, 3).astype(jnp.float32) * 0.125
    b1 = jax.random.randint(kb, (NUM_OUTPUTS,), -2, 3).astype(jnp.float32) * 0.125

    # One-time weight prep (cached across all forwards of this individual).
    w_pad, b_pad = prepare_params(w1, b1)

    # Case 1: module-default tiny shape (B=2, T=8) -- single block, no padding.
    B, T = 2, 8
    x = jax.random.randint(kx, (B, T, NUM_INPUTS), -2, 3).astype(jnp.float32) * 0.25
    out = leaky_one_layer_forward(x, w_pad, b_pad, num_outputs=NUM_OUTPUTS)
    out = jax.block_until_ready(out)
    ref = _reference_forward(x, w1, b1)
    assert out.shape == (B, NUM_OUTPUTS)
    # Tolerance covers pl.reciprocal(approx=True) (~2^-12 relative) in the softmax.
    assert jnp.allclose(out, ref, atol=2e-3), "mismatch vs. pure-JAX reference (B=2)"

    # Case 2: exercise the batch grid + padding path (tile_b=8 -> 3 parallel blocks).
    B2 = 20
    x2 = jax.random.randint(kx2, (B2, T, NUM_INPUTS), -2, 3).astype(jnp.float32) * 0.25
    out2 = leaky_one_layer_forward(x2, w_pad, b_pad, num_outputs=NUM_OUTPUTS, tile_b=8)
    out2 = jax.block_until_ready(out2)
    ref2 = _reference_forward(x2, w1, b1)
    assert out2.shape == (B2, NUM_OUTPUTS)
    assert jnp.allclose(out2, ref2, atol=2e-3), "mismatch vs. pure-JAX reference (B=20)"

    # TODO(synk): mutate()/crossover()/describe() are host-side evolutionary
    # utilities (parameter perturbation), not part of the forward pass.
    print("KERNEL_OK")
</pallas_src>

<mosaic_0001>
module attributes {stable_mosaic.version = 11 : i64} {
  func.func @_leaky_one_layer_kernel(%arg0: i32, %arg1: memref<8x2x784xf32, #tpu.memory_space<vmem>>, %arg2: memref<784x128xf32, #tpu.memory_space<vmem>>, %arg3: memref<1x128xf32, #tpu.memory_space<vmem>>, %arg4: memref<2x128xf32, #tpu.memory_space<vmem>>) attributes {dimension_semantics = [#tpu.dimension_semantics<parallel>], iteration_bounds = array<i64: 1>, scalar_prefetch = 0 : i64, scratch_operands = 0 : i64, tpu.core_type = #tpu.core_type<tc>, window_params = [{transform_indices = @transform_0, window_bounds = array<i64: 8, 2, 784>}, {pipeline_mode = #tpu.pipeline_mode<synchronous>, transform_indices = @transform_1, window_bounds = array<i64: 784, 128>}, {pipeline_mode = #tpu.pipeline_mode<synchronous>, transform_indices = @transform_2, window_bounds = array<i64: 1, 128>}, {transform_indices = @transform_3, window_bounds = array<i64: 2, 128>}]} {
    %c0 = arith.constant 0 : index
    %c0_0 = arith.constant 0 : index
    %c0_1 = arith.constant 0 : index
    %0 = vector.load %arg1[%c0, %c0_0, %c0_1] : memref<8x2x784xf32, #tpu.memory_space<vmem>>, vector<8x2x784xf32>
    %1 = vector.shape_cast %0 : vector<8x2x784xf32> to vector<16x784xf32>
    %c0_2 = arith.constant 0 : index
    %c0_3 = arith.constant 0 : index
    %2 = vector.load %arg2[%c0_2, %c0_3] : memref<784x128xf32, #tpu.memory_space<vmem>>, vector<784x128xf32>
    %cst = arith.constant dense<0.000000e+00> : vector<16x128xf32>
    %3 = tpu.matmul %1, %2, %cst {dimension_numbers = #tpu.dot_dimension_numbers<[1], [0], [0], [1], [0, 0, 1, 1], [], []>} : vector<16x784xf32>, vector<784x128xf32>, vector<16x128xf32> -> vector<16x128xf32>
    %c0_4 = arith.constant 0 : index
    %c0_5 = arith.constant 0 : index
    %4 = vector.load %arg3[%c0_4, %c0_5] : memref<1x128xf32, #tpu.memory_space<vmem>>, vector<1x128xf32>
    %5 = vector.broadcast %4 : vector<1x128xf32> to vector<16x128xf32>
    %6 = arith.addf %3, %5 : vector<16x128xf32>
    %7 = vector.shape_cast %6 : vector<16x128xf32> to vector<8x2x128xf32>
    %cst_6 = arith.constant 0.000000e+00 : f32
    %8 = vector.broadcast %cst_6 : f32 to vector<2x128xf32>
    %cst_7 = arith.constant 0.000000e+00 : f32
    %9 = vector.broadcast %cst_7 : f32 to vector<2x128xf32>
    %10 = vector.extract_strided_slice %7 {offsets = [0, 0, 0], sizes = [1, 2, 128], strides = [1, 1, 1]} : vector<8x2x128xf32> to vector<1x2x128xf32>
    %11 = vector.shape_cast %10 : vector<1x2x128xf32> to vector<2x128xf32>
    %cst_8 = arith.constant 1.000000e+00 : f32
    %12 = vector.broadcast %cst_8 : f32 to vector<2x128xf32>
    %13 = arith.cmpf ogt, %8, %12 : vector<2x128xf32>
    %14 = arith.extui %13 : vector<2x128xi1> to vector<2x128xi32>
    %15 = arith.sitofp %14 : vector<2x128xi32> to vector<2x128xf32>
    %cst_9 = arith.constant 1.000000e-01 : f32
    %16 = vector.broadcast %cst_9 : f32 to vector<2x128xf32>
    %17 = arith.mulf %16, %8 : vector<2x128xf32>
    %18 = arith.addf %17, %11 : vector<2x128xf32>
    %cst_10 = arith.constant 1.000000e+00 : f32
    %19 = vector.broadcast %cst_10 : f32 to vector<2x128xf32>
    %20 = arith.mulf %15, %19 : vector<2x128xf32>
    %21 = arith.subf %18, %20 : vector<2x128xf32>
    %cst_11 = arith.constant 1.000000e+00 : f32
    %22 = vector.broadcast %cst_11 : f32 to vector<2x128xf32>
    %23 = arith.cmpf ogt, %21, %22 : vector<2x128xf32>
    %24 = arith.extui %23 : vector<2x128xi1> to vector<2x128xi32>
    %25 = arith.sitofp %24 : vector<2x128xi32> to vector<2x128xf32>
    %26 = arith.addf %9, %25 : vector<2x128xf32>
    %27 = vector.extract_strided_slice %7 {offsets = [1, 0, 0], sizes = [1, 2, 128], strides = [1, 1, 1]} : vector<8x2x128xf32> to vector<1x2x128xf32>
    %28 = vector.shape_cast %27 : vector<1x2x128xf32> to vector<2x128xf32>
    %cst_12 = arith.constant 1.000000e+00 : f32
    %29 = vector.broadcast %cst_12 : f32 to vector<2x128xf32>
    %30 = arith.cmpf ogt, %21, %29 : vector<2x128xf32>
    %31 = arith.extui %30 : vector<2x128xi1> to vector<2x128xi32>
    %32 = arith.sitofp %31 : vector<2x128xi32> to vector<2x128xf32>
    %cst_13 = arith.constant 1.000000e-01 : f32
    %33 = vector.broadcast %cst_13 : f32 to vector<2x128xf32>
    %34 = arith.mulf %33, %21 : vector<2x128xf32>
    %35 = arith.addf %34, %28 : vector<2x128xf32>
    %cst_14 = arith.constant 1.000000e+00 : f32
    %36 = vector.broadcast %cst_14 : f32 to vector<2x128xf32>
    %37 = arith.mulf %32, %36 : vector<2x128xf32>
    %38 = arith.subf %35, %37 : vector<2x128xf32>
    %cst_15 = arith.constant 1.000000e+00 : f32
    %39 = vector.broadcast %cst_15 : f32 to vector<2x128xf32>
    %40 = arith.cmpf ogt, %38, %39 : vector<2x128xf32>
    %41 = arith.extui %40 : vector<2x128xi1> to vector<2x128xi32>
    %42 = arith.sitofp %41 : vector<2x128xi32> to vector<2x128xf32>
    %43 = arith.addf %26, %42 : vector<2x128xf32>
    %44 = vector.extract_strided_slice %7 {offsets = [2, 0, 0], sizes = [1, 2, 128], strides = [1, 1, 1]} : vector<8x2x128xf32> to vector<1x2x128xf32>
    %45 = vector.shape_cast %44 : vector<1x2x128xf32> to vector<2x128xf32>
    %cst_16 = arith.constant 1.000000e+00 : f32
    %46 = vector.broadcast %cst_16 : f32 to vector<2x128xf32>
    %47 = arith.cmpf ogt, %38, %46 : vector<2x128xf32>
    %48 = arith.extui %47 : vector<2x128xi1> to vector<2x128xi32>
    %49 = arith.sitofp %48 : vector<2x128xi32> to vector<2x128xf32>
    %cst_17 = arith.constant 1.000000e-01 : f32
    %50 = vector.broadcast %cst_17 : f32 to vector<2x128xf32>
    %51 = arith.mulf %50, %38 : vector<2x128xf32>
    %52 = arith.addf %51, %45 : vector<2x128xf32>
    %cst_18 = arith.constant 1.000000e+00 : f32
    %53 = vector.broadcast %cst_18 : f32 to vector<2x128xf32>
    %54 = arith.mulf %49, %53 : vector<2x128xf32>
    %55 = arith.subf %52, %54 : vector<2x128xf32>
    %cst_19 = arith.constant 1.000000e+00 : f32
    %56 = vector.broadcast %cst_19 : f32 to vector<2x128xf32>
    %57 = arith.cmpf ogt, %55, %56 : vector<2x128xf32>
    %58 = arith.extui %57 : vector<2x128xi1> to vector<2x128xi32>
    %59 = arith.sitofp %58 : vector<2x128xi32> to vector<2x128xf32>
    %60 = arith.addf %43, %59 : vector<2x128xf32>
    %61 = vector.extract_strided_slice %7 {offsets = [3, 0, 0], sizes = [1, 2, 128], strides = [1, 1, 1]} : vector<8x2x128xf32> to vector<1x2x128xf32>
    %62 = vector.shape_cast %61 : vector<1x2x128xf32> to vector<2x128xf32>
    %cst_20 = arith.constant 1.000000e+00 : f32
    %63 = vector.broadcast %cst_20 : f32 to vector<2x128xf32>
    %64 = arith.cmpf ogt, %55, %63 : vector<2x128xf32>
    %65 = arith.extui %64 : vector<2x128xi1> to vector<2x128xi32>
    %66 = arith.sitofp %65 : vector<2x128xi32> to vector<2x128xf32>
    %cst_21 = arith.constant 1.000000e-01 : f32
    %67 = vector.broadcast %cst_21 : f32 to vector<2x128xf32>
    %68 = arith.mulf %67, %55 : vector<2x128xf32>
    %69 = arith.addf %68, %62 : vector<2x128xf32>
    %cst_22 = arith.constant 1.000000e+00 : f32
    %70 = vector.broadcast %cst_22 : f32 to vector<2x128xf32>
    %71 = arith.mulf %66, %70 : vector<2x128xf32>
    %72 = arith.subf %69, %71 : vector<2x128xf32>
    %cst_23 = arith.constant 1.000000e+00 : f32
    %73 = vector.broadcast %cst_23 : f32 to vector<2x128xf32>
    %74 = arith.cmpf ogt, %72, %73 : vector<2x128xf32>
    %75 = arith.extui %74 : vector<2x128xi1> to vector<2x128xi32>
    %76 = arith.sitofp %75 : vector<2x128xi32> to vector<2x128xf32>
    %77 = arith.addf %60, %76 : vector<2x128xf32>
    %78 = vector.extract_strided_slice %7 {offsets = [4, 0, 0], sizes = [1, 2, 128], strides = [1, 1, 1]} : vector<8x2x128xf32> to vector<1x2x128xf32>
    %79 = vector.shape_cast %78 : vector<1x2x128xf32> to vector<2x128xf32>
    %cst_24 = arith.constant 1.000000e+00 : f32
    %80 = vector.broadcast %cst_24 : f32 to vector<2x128xf32>
    %81 = arith.cmpf ogt, %72, %80 : vector<2x128xf32>
    %82 = arith.extui %81 : vector<2x128xi1> to vector<2x128xi32>
    %83 = arith.sitofp %82 : vector<2x128xi32> to vector<2x128xf32>
    %cst_25 = arith.constant 1.000000e-01 : f32
    %84 = vector.broadcast %cst_25 : f32 to vector<2x128xf32>
    %85 = arith.mulf %84, %72 : vector<2x128xf32>
    %86 = arith.addf %85, %79 : vector<2x128xf32>
    %cst_26 = arith.constant 1.000000e+00 : f32
    %87 = vector.broadcast %cst_26 : f32 to vector<2x128xf32>
    %88 = arith.mulf %83, %87 : vector<2x128xf32>
    %89 = arith.subf %86, %88 : vector<2x128xf32>
    %cst_27 = arith.constant 1.000000e+00 : f32
    %90 = vector.broadcast %cst_27 : f32 to vector<2x128xf32>
    %91 = arith.cmpf ogt, %89, %90 : vector<2x128xf32>
    %92 = arith.extui %91 : vector<2x128xi1> to vector<2x128xi32>
    %93 = arith.sitofp %92 : vector<2x128xi32> to vector<2x128xf32>
    %94 = arith.addf %77, %93 : vector<2x128xf32>
    %95 = vector.extract_strided_slice %7 {offsets = [5, 0, 0], sizes = [1, 2, 128], strides = [1, 1, 1]} : vector<8x2x128xf32> to vector<1x2x128xf32>
    %96 = vector.shape_cast %95 : vector<1x2x128xf32> to vector<2x128xf32>
    %cst_28 = arith.constant 1.000000e+00 : f32
    %97 = vector.broadcast %cst_28 : f32 to vector<2x128xf32>
    %98 = arith.cmpf ogt, %89, %97 : vector<2x128xf32>
    %99 = arith.extui %98 : vector<2x128xi1> to vector<2x128xi32>
    %100 = arith.sitofp %99 : vector<2x128xi32> to vector<2x128xf32>
    %cst_29 = arith.constant 1.000000e-01 : f32
    %101 = vector.broadcast %cst_29 : f32 to vector<2x128xf32>
    %102 = arith.mulf %101, %89 : vector<2x128xf32>
    %103 = arith.addf %102, %96 : vector<2x128xf32>
    %cst_30 = arith.constant 1.000000e+00 : f32
    %104 = vector.broadcast %cst_30 : f32 to vector<2x128xf32>
    %105 = arith.mulf %100, %104 : vector<2x128xf32>
    %106 = arith.subf %103, %105 : vector<2x128xf32>
    %cst_31 = arith.constant 1.000000e+00 : f32
    %107 = vector.broadcast %cst_31 : f32 to vector<2x128xf32>
    %108 = arith.cmpf ogt, %106, %107 : vector<2x128xf32>
    %109 = arith.extui %108 : vector<2x128xi1> to vector<2x128xi32>
    %110 = arith.sitofp %109 : vector<2x128xi32> to vector<2x128xf32>
    %111 = arith.addf %94, %110 : vector<2x128xf32>
    %112 = vector.extract_strided_slice %7 {offsets = [6, 0, 0], sizes = [1, 2, 128], strides = [1, 1, 1]} : vector<8x2x128xf32> to vector<1x2x128xf32>
    %113 = vector.shape_cast %112 : vector<1x2x128xf32> to vector<2x128xf32>
    %cst_32 = arith.constant 1.000000e+00 : f32
    %114 = vector.broadcast %cst_32 : f32 to vector<2x128xf32>
    %115 = arith.cmpf ogt, %106, %114 : vector<2x128xf32>
    %116 = arith.extui %115 : vector<2x128xi1> to vector<2x128xi32>
    %117 = arith.sitofp %116 : vector<2x128xi32> to vector<2x128xf32>
    %cst_33 = arith.constant 1.000000e-01 : f32
    %118 = vector.broadcast %cst_33 : f32 to vector<2x128xf32>
    %119 = arith.mulf %118, %106 : vector<2x128xf32>
    %120 = arith.addf %119, %113 : vector<2x128xf32>
    %cst_34 = arith.constant 1.000000e+00 : f32
    %121 = vector.broadcast %cst_34 : f32 to vector<2x128xf32>
    %122 = arith.mulf %117, %121 : vector<2x128xf32>
    %123 = arith.subf %120, %122 : vector<2x128xf32>
    %cst_35 = arith.constant 1.000000e+00 : f32
    %124 = vector.broadcast %cst_35 : f32 to vector<2x128xf32>
    %125 = arith.cmpf ogt, %123, %124 : vector<2x128xf32>
    %126 = arith.extui %125 : vector<2x128xi1> to vector<2x128xi32>
    %127 = arith.sitofp %126 : vector<2x128xi32> to vector<2x128xf32>
    %128 = arith.addf %111, %127 : vector<2x128xf32>
    %129 = vector.extract_strided_slice %7 {offsets = [7, 0, 0], sizes = [1, 2, 128], strides = [1, 1, 1]} : vector<8x2x128xf32> to vector<1x2x128xf32>
    %130 = vector.shape_cast %129 : vector<1x2x128xf32> to vector<2x128xf32>
    %cst_36 = arith.constant 1.000000e+00 : f32
    %131 = vector.broadcast %cst_36 : f32 to vector<2x128xf32>
    %132 = arith.cmpf ogt, %123, %131 : vector<2x128xf32>
    %133 = arith.extui %132 : vector<2x128xi1> to vector<2x128xi32>
    %134 = arith.sitofp %133 : vector<2x128xi32> to vector<2x128xf32>
    %cst_37 = arith.constant 1.000000e-01 : f32
    %135 = vector.broadcast %cst_37 : f32 to vector<2x128xf32>
    %136 = arith.mulf %135, %123 : vector<2x128xf32>
    %137 = arith.addf %136, %130 : vector<2x128xf32>
    %cst_38 = arith.constant 1.000000e+00 : f32
    %138 = vector.broadcast %cst_38 : f32 to vector<2x128xf32>
    %139 = arith.mulf %134, %138 : vector<2x128xf32>
    %140 = arith.subf %137, %139 : vector<2x128xf32>
    %cst_39 = arith.constant 1.000000e+00 : f32
    %141 = vector.broadcast %cst_39 : f32 to vector<2x128xf32>
    %142 = arith.cmpf ogt, %140, %141 : vector<2x128xf32>
    %143 = arith.extui %142 : vector<2x128xi1> to vector<2x128xi32>
    %144 = arith.sitofp %143 : vector<2x128xi32> to vector<2x128xf32>
    %145 = arith.addf %128, %144 : vector<2x128xf32>
    %146 = tpu.iota {dimensions = array<i32: 1>} : vector<2x128xi32>
    %c10_i32 = arith.constant 10 : i32
    %147 = vector.broadcast %c10_i32 : i32 to vector<2x128xi32>
    %148 = arith.cmpi slt, %146, %147 : vector<2x128xi32>
    %149 = math.exp %145 : vector<2x128xf32>
    %cst_40 = arith.constant 0.000000e+00 : f32
    %150 = vector.broadcast %cst_40 : f32 to vector<2x128xf32>
    %151 = arith.select %148, %149, %150 : vector<2x128xi1>, vector<2x128xf32>
    %cst_41 = arith.constant dense<0.000000e+00> : vector<2xf32>
    %152 = vector.multi_reduction <add>, %151, %cst_41 [1] : vector<2x128xf32> to vector<2xf32>
    %153 = vector.shape_cast %152 : vector<2xf32> to vector<2x1xf32>
    %154 = tpu.reciprocal %153 {approx = true} : vector<2x1xf32> -> vector<2x1xf32>
    %155 = vector.broadcast %154 : vector<2x1xf32> to vector<2x128xf32>
    %156 = arith.mulf %151, %155 : vector<2x128xf32>
    %c0_42 = arith.constant 0 : index
    %c0_43 = arith.constant 0 : index
    %157 = vector.load %arg4[%c0_42, %c0_43] : memref<2x128xf32, #tpu.memory_space<vmem>>, vector<2x128xf32>
    tpu.vector_store %arg4[%c0_42, %c0_43], %156 {strides = array<i32>} : memref<2x128xf32, #tpu.memory_space<vmem>>, vector<2x128xf32>,
    return
  }
  func.func @transform_0(%arg0: i32) -> (i32, i32, i32) {
    %c0_i32 = arith.constant 0 : i32
    %c0_i32_0 = arith.constant 0 : i32
    %c0_i32_1 = arith.constant 0 : i32
    return %c0_i32, %arg0, %c0_i32_0 : i32, i32, i32
  }
  func.func @transform_1(%arg0: i32) -> (i32, i32) {
    %c0_i32 = arith.constant 0 : i32
    %c0_i32_0 = arith.constant 0 : i32
    %c0_i32_1 = arith.constant 0 : i32
    return %c0_i32, %c0_i32_0 : i32, i32
  }
  func.func @transform_2(%arg0: i32) -> (i32, i32) {
    %c0_i32 = arith.constant 0 : i32
    %c0_i32_0 = arith.constant 0 : i32
    %c0_i32_1 = arith.constant 0 : i32
    return %c0_i32, %c0_i32_0 : i32, i32
  }
  func.func @transform_3(%arg0: i32) -> (i32, i32) {
    %c0_i32 = arith.constant 0 : i32
    %c0_i32_0 = arith.constant 0 : i32
    return %arg0, %c0_i32 : i32, i32
  }
}

</mosaic_0001>

<bundles_post_ra>
// kernel: leaky_one_layer_forward.1
= control target key start
LH: loop header
LB: loop body
LE: loop exit
PB: predicated region body
PF: predicated region fallthrough
CT: control target
= control target key end

     0   :  { %8 = vsyncpa [#allocation3], 0  ;;  %s654_s0 = inlined_call_operand.vmem [shape: f32[8,2,784], index: 0, kind: input, shape index: {}]   ;;  %s655_s1 = inlined_call_operand.hbm [shape: f32[784,128], index: 1, kind: input, shape index: {}]   ;;  %s656_s2 = inlined_call_operand.vmem [shape: f32[1,128], index: 2, kind: input, shape index: {}]   ;;  %s657_s3 = inlined_call_operand.hbm [shape: f32[2,128], index: 3, kind: output, shape index: {}]  }
   0x1   :  { %9 = vsyncpa [#allocation4], 0  ;;  %s16_s14 = sshll.u32 %s655_s1, 4  ;;  %s570_s15 = smov [#allocation2]   ;;  %s17_s14 = int_to_ptr.hbm [resolvable:$true] %s16_s14 }
   0x2   :  { %s18_s16 = sshll.u32 %s570_s15, 4  ;;  %s571_s17 = smov 128   ;;  %s19_s16 = int_to_ptr.vmem [resolvable:$true] %s18_s16 }
   0x3   :  { %s572_s18 = smov 8  }
   0x4   :  { %24 = dma.hbm_to_vmem [thread:$0]  %s17_s14, 12544, %s19_s16, [#allocation3], %s571_s17, %s571_s17, %s572_s18  }
   0x5   :  { %566 = dma.done.wait [#allocation3], 12544  }
   0x6   :  { %567 = vsyncadd [#allocation3], 4294954752  ;;  %v62_v0 = vld [vmem:[#allocation2 + $0x78] sm:$0xff]  ;;  %v61_v3 = vld [vmem:[#allocation2 + $0x70] sm:$0xff]  ;;  %vm214_vm0 = vcmask 130048   ;;  %vm458_vm10 = vcmask 1041408  }
   0x7   :  { %v78_v1 = vld [vmem:[#allocation2 + $0xf8] sm:$0xff]  ;;  %219 = vmatpush.msra.mxu0 %v62_v0  ;;  %v77_v4 = vld [vmem:[#allocation2 + $0xf0] sm:$0xff]  ;;  %v60_v6 = vld [vmem:[#allocation2 + $0x68] sm:$0xff]  ;;  %s472_s26 = sshll.u32 %s657_s3, 4  ;;  %s473_s26 = int_to_ptr.hbm [resolvable:$true] %s472_s26 }
   0x8   :  { %v110_v2 = vld [vmem:[#allocation2 + $0x1f8] sm:$0xff]  ;;  %242 = vmatpush.msra.mxu1 %v78_v1  ;;  %v109_v5 = vld [vmem:[#allocation2 + $0x1f0] sm:$0xff]  ;;  %v76_v7 = vld [vmem:[#allocation2 + $0xe8] sm:$0xff] }
   0x9   :  { %288 = vmatpush.msra.mxu3 %v110_v2  ;;  %220 = vmatpush.msra.mxu0 %v61_v3  ;;  %v108_v8 = vld [vmem:[#allocation2 + $0x1e8] sm:$0xff]  ;;  %v59_v9 = vld [vmem:[#allocation2 + $0x60] sm:$0xff]  ;;  %v58_v12 = vld [vmem:[#allocation2 + $0x58] sm:$0xff] }
   0xa   :  { %243 = vmatpush.msra.mxu1 %v77_v4  ;;  %v75_v10 = vld [vmem:[#allocation2 + $0xe0] sm:$0xff]  ;;  %v74_v13 = vld [vmem:[#allocation2 + $0xd8] sm:$0xff]  ;;  %v93_v16 = vld [vmem:[#allocation2 + $0x170] sm:$0xff] }
   0xb   :  { %289 = vmatpush.msra.mxu3 %v109_v5  ;;  %221 = vmatpush.msra.mxu0 %v60_v6  ;;  %v107_v11 = vld [vmem:[#allocation2 + $0x1e0] sm:$0xff]  ;;  %v94_v14 = vld [vmem:[#allocation2 + $0x178] sm:$0xff]  ;;  %v57_v17 = vld [vmem:[#allocation2 + $0x50] sm:$0xff] }
   0xc   :  { %244 = vmatpush.msra.mxu1 %v76_v7  ;;  %v106_v15 = vld [vmem:[#allocation2 + $0x1d8] sm:$0xff]  ;;  %v73_v18 = vld [vmem:[#allocation2 + $0xd0] sm:$0xff]  ;;  %265 = vmatpush.msra.mxu2 %v94_v14  ;;  %v92_v20 = vld [vmem:[#allocation2 + $0x168] sm:$0xff] }
   0xd   :  { %290 = vmatpush.msra.mxu3 %v108_v8  ;;  %222 = vmatpush.msra.mxu0 %v59_v9  ;;  %v105_v19 = vld [vmem:[#allocation2 + $0x1d0] sm:$0xff]  ;;  %v56_v21 = vld [vmem:[#allocation2 + $0x48] sm:$0xff]  ;;  %v91_v24 = vld [vmem:[#allocation2 + $0x160] sm:$0xff] }
   0xe   :  { %245 = vmatpush.msra.mxu1 %v75_v10  ;;  %v72_v22 = vld [vmem:[#allocation2 + $0xc8] sm:$0xff]  ;;  %266 = vmatpush.msra.mxu2 %v93_v16  ;;  %v55_v25 = vld [vmem:[#allocation2 + $0x40] sm:$0xff]  ;;  %v90_v28 = vld [vmem:[#allocation2 + $0x158] sm:$0xff] }
   0xf   :  { %291 = vmatpush.msra.mxu3 %v107_v11  ;;  %223 = vmatpush.msra.mxu0 %v58_v12  ;;  %v104_v23 = vld [vmem:[#allocation2 + $0x1c8] sm:$0xff]  ;;  %v71_v26 = vld [vmem:[#allocation2 + $0xc0] sm:$0xff]  ;;  %v54_v29 = vld [vmem:[#allocation2 + $0x38] sm:$0xff] }
  0x10   :  { %246 = vmatpush.msra.mxu1 %v74_v13  ;;  %267 = vmatpush.msra.mxu2 %v92_v20  ;;  %v103_v27 = vld [vmem:[#allocation2 + $0x1c0] sm:$0xff]  ;;  %v70_v30 = vld [vmem:[#allocation2 + $0xb8] sm:$0xff]  ;;  %v89_v32 = vld [vmem:[#allocation2 + $0x150] sm:$0xff] }
  0x11   :  { %292 = vmatpush.msra.mxu3 %v106_v15  ;;  %224 = vmatpush.msra.mxu0 %v57_v17  ;;  %v102_v31 = vld [vmem:[#allocation2 + $0x1b8] sm:$0xff]  ;;  %v53_v33 = vld [vmem:[#allocation2 + $0x30] sm:$0xff]  ;;  %v88_v36 = vld [vmem:[#allocation2 + $0x148] sm:$0xff] }
  0x12   :  { %247 = vmatpush.msra.mxu1 %v73_v18  ;;  %268 = vmatpush.msra.mxu2 %v91_v24  ;;  %v69_v34 = vld [vmem:[#allocation2 + $0xb0] sm:$0xff]  ;;  %v52_v37 = vld [vmem:[#allocation2 + $0x28] sm:$0xff]  ;;  %v87_v40 = vld [vmem:[#allocation2 + $0x140] sm:$0xff] }
  0x13   :  { %293 = vmatpush.msra.mxu3 %v105_v19  ;;  %225 = vmatpush.msra.mxu0 %v56_v21  ;;  %v101_v35 = vld [vmem:[#allocation2 + $0x1b0] sm:$0xff]  ;;  %v68_v38 = vld [vmem:[#allocation2 + $0xa8] sm:$0xff]  ;;  %v51_v41 = vld [vmem:[#allocation2 + $0x20] sm:$0xff] }
  0x14   :  { %248 = vmatpush.msra.mxu1 %v72_v22  ;;  %269 = vmatpush.msra.mxu2 %v90_v28  ;;  %v100_v39 = vld [vmem:[#allocation2 + $0x1a8] sm:$0xff]  ;;  %v67_v42 = vld [vmem:[#allocation2 + $0xa0] sm:$0xff]  ;;  %v86_v44 = vld [vmem:[#allocation2 + $0x138] sm:$0xff] }
  0x15   :  { %294 = vmatpush.msra.mxu3 %v104_v23  ;;  %226 = vmatpush.msra.mxu0 %v55_v25  ;;  %v99_v43 = vld [vmem:[#allocation2 + $0x1a0] sm:$0xff]  ;;  %v50_v45 = vld [vmem:[#allocation2 + $0x18] sm:$0xff]  ;;  %v49_v48 = vld [vmem:[#allocation2 + $0x10] sm:$0xff] }
  0x16   :  { %249 = vmatpush.msra.mxu1 %v71_v26  ;;  %270 = vmatpush.msra.mxu2 %v89_v32  ;;  %v66_v46 = vld [vmem:[#allocation2 + $0x98] sm:$0xff]  ;;  %v85_v49 = vld [vmem:[#allocation2 + $0x130] sm:$0xff]  ;;  %v48_v52 = vld [vmem:[#allocation2 + $0x8] sm:$0xff] }
  0x17   :  { %295 = vmatpush.msra.mxu3 %v103_v27  ;;  %227 = vmatpush.msra.mxu0 %v54_v29  ;;  %v98_v47 = vld [vmem:[#allocation2 + $0x198] sm:$0xff]  ;;  %v65_v50 = vld [vmem:[#allocation2 + $0x90] sm:$0xff]  ;;  %v84_v53 = vld [vmem:[#allocation2 + $0x128] sm:$0xff] }
  0x18   :  { %250 = vmatpush.msra.mxu1 %v70_v30  ;;  %271 = vmatpush.msra.mxu2 %v88_v36  ;;  %v97_v51 = vld [vmem:[#allocation2 + $0x190] sm:$0xff]  ;;  %v31_v54 = vld [vmem:[%s654_s0] sm:$0xff]  ;;  %v33_v55 = vld [vmem:[%s654_s0 + $0xe] sm:$0xff] }
  0x19   :  { %296 = vmatpush.msra.mxu3 %v102_v31  ;;  %228 = vmatpush.msra.mxu0 %v53_v33  ;;  %v64_v56 = vld [vmem:[#allocation2 + $0x88] sm:$0xff]  ;;  %v35_v57 = vld [vmem:[%s654_s0 + $0x1c] sm:$0xff]  ;;  %165 = vst [vmem:[#allocation1] ss:$4 sm:$0xff] %v31_v54  ;;  %v83_v60 = vld [vmem:[#allocation2 + $0x120] sm:$0xff] }
  0x1a   :  { %251 = vmatpush.msra.mxu1 %v69_v34  ;;  %272 = vmatpush.msra.mxu2 %v87_v40  ;;  %v37_v58 = vld [vmem:[%s654_s0 + $0x2a] sm:$0xff]  ;;  %167 = vst [vmem:[#allocation1 + $0x1] ss:$4 sm:$0xff] %v33_v55  ;;  %v126_v0 = vld [vmem:[#allocation2 + $0x278] sm:$0xff]  ;;  %v125_v2 = vld [vmem:[#allocation2 + $0x270] sm:$0xff] }
  0x1b   :  { %297 = vmatpush.msra.mxu3 %v101_v35  ;;  %229 = vmatpush.msra.mxu0 %v52_v37  ;;  %v96_v59 = vld [vmem:[#allocation2 + $0x188] sm:$0xff]  ;;  %v47_v61 = vld [vmem:[#allocation2] sm:$0xff]  ;;  %169 = vst [vmem:[#allocation1 + $0x2] ss:$4 sm:$0xff] %v35_v57  ;;  %v142_v1 = vld [vmem:[#allocation2 + $0x2f8] sm:$0xff] }
  0x1c   :  { %252 = vmatpush.msra.mxu1 %v68_v38  ;;  %273 = vmatpush.msra.mxu2 %v86_v44  ;;  %v63_v62 = vld [vmem:[#allocation2 + $0x80] sm:$0xff]  ;;  %171 = vst [vmem:[#allocation1 + $0x3] ss:$4 sm:$0xff] %v37_v58  ;;  %v82_v3 = vld [vmem:[#allocation2 + $0x118] sm:$0xff]  ;;  %v141_v4 = vld [vmem:[#allocation2 + $0x2f0] sm:$0xff] }
  0x1d   :  { %298 = vmatpush.msra.mxu3 %v100_v39  ;;  %230 = vmatpush.msra.mxu0 %v51_v41  ;;  %v95_v63 = vld [vmem:[#allocation2 + $0x180] sm:$0xff]  ;;  %v124_v5 = vld [vmem:[#allocation2 + $0x268] sm:$0xff]  ;;  %v81_v7 = vld [vmem:[#allocation2 + $0x110] sm:$0xff] }
  0x1e   :  { %253 = vmatpush.msra.mxu1 %v67_v42  ;;  %274 = vmatpush.msra.mxu2 %v85_v49  ;;  %v140_v6 = vld [vmem:[#allocation2 + $0x2e8] sm:$0xff]  ;;  %v123_v8 = vld [vmem:[#allocation2 + $0x260] sm:$0xff]  ;;  %v122_v12 = vld [vmem:[#allocation2 + $0x258] sm:$0xff] }
  0x1f   :  { %299 = vmatpush.msra.mxu3 %v99_v43  ;;  %231 = vmatpush.msra.mxu0 %v50_v45  ;;  %v139_v9 = vld [vmem:[#allocation2 + $0x2e0] sm:$0xff]  ;;  %v80_v10 = vld [vmem:[#allocation2 + $0x108] sm:$0xff]  ;;  %v39_v14 = vld [vmem:[%s654_s0 + $0x38] sm:$0xff] }
  0x20   :  { %254 = vmatpush.msra.mxu1 %v66_v46  ;;  %275 = vmatpush.msra.mxu2 %v84_v53  ;;  %v32_v11 = vld [vmem:[%s654_s0 + $0x8] sm:$0x3f]  ;;  %v43_v16 = vld [vmem:[%s654_s0 + $0x54] sm:$0xff]  ;;  %v138_v21 = vld [vmem:[#allocation2 + $0x2d8] sm:$0xff] }
  0x21   :  { %300 = vmatpush.msra.mxu3 %v98_v47  ;;  %232 = vmatpush.msra.mxu0 %v49_v48  ;;  %v79_v13 = vld [vmem:[#allocation2 + $0x100] sm:$0xff]  ;;  %173 = vst [vmem:[#allocation1 + $0x20] ss:$4 sm:$0xff] %v32_v11  ;;  %v121_v23 = vld [vmem:[#allocation2 + $0x250] sm:$0xff]  ;;  %v120_v27 = vld [vmem:[#allocation2 + $0x248] sm:$0xff] }
  0x22   :  { %255 = vmatpush.msra.mxu1 %v65_v50  ;;  %276 = vmatpush.msra.mxu2 %v83_v60  ;;  %v41_v15 = vld [vmem:[%s654_s0 + $0x46] sm:$0xff]  ;;  %v137_v24 = vld [vmem:[#allocation2 + $0x2d0] sm:$0xff]  ;;  %v144_v28 = vld [vmem:[#allocation2 + $0x308] sm:$0xff] }
  0x23   :  { %301 = vmatpush.msra.mxu3 %v97_v51  ;;  %233 = vmatpush.msra.mxu0 %v48_v52  ;;  %v182_v17 = vld.sshfl [vmem:[#allocation1 + $0x10] sm:$0xff pattern:$0x73625140]  ;;  %v180_v18 = vld.sshfl [vmem:[#allocation1] sm:$0xff pattern:$0x73625140] }
  0x24   :  { %256 = vmatpush.msra.mxu1 %v64_v56  ;;  %277 = vmatpush.msra.mxu2 %v82_v3  ;;  %v181_v19 = vld.sshfl [vmem:[#allocation1 + $0x8] sm:$0xff pattern:$0x73625140]  ;;  %v183_v20 = vld.sshfl [vmem:[#allocation1 + $0x18] sm:$0xff pattern:$0x73625140] }
  0x25   :  { %302 = vmatpush.msra.mxu3 %v96_v59  ;;  %234 = vmatpush.msra.mxu0 %v47_v61  ;;  %v45_v22 = vld [vmem:[%s654_s0 + $0x62] sm:$0xff]  ;;  %187 = vst [vmem:[#allocation1] ss:$4 sm:$0xff] %v39_v14  ;;  %v34_v25 = vld [vmem:[%s654_s0 + $0x16] sm:$0x3f] }
  0x26   :  { %257 = vmatpush.msra.mxu1 %v63_v62  ;;  %278 = vmatpush.msra.mxu2 %v81_v7  ;;  %188 = vst [vmem:[#allocation1 + $0x1] ss:$4 sm:$0xff] %v41_v15  ;;  %v36_v26 = vld [vmem:[%s654_s0 + $0x24] sm:$0x3f]  ;;  %v38_v29 = vld [vmem:[%s654_s0 + $0x32] sm:$0x3f] }
  0x27   :  { %303 = vmatpush.msra.mxu3 %v95_v63  ;;  %311 = vmatpush.msrb.mxu0 %v126_v0  ;;  %189 = vst [vmem:[#allocation1 + $0x2] ss:$4 sm:$0xff] %v43_v16  ;;  %v136_v30 = vld [vmem:[#allocation2 + $0x2c8] sm:$0xff]  ;;  %v119_v31 = vld [vmem:[#allocation2 + $0x240] sm:$0xff]  ;;  %v118_v33 = vld [vmem:[#allocation2 + $0x238] sm:$0xff] }
  0x28   :  { %334 = vmatpush.msrb.mxu1 %v142_v1  ;;  %279 = vmatpush.msra.mxu2 %v80_v10  ;;  %190 = vst [vmem:[#allocation1 + $0x3] ss:$4 sm:$0xff] %v45_v22  ;;  %v135_v32 = vld [vmem:[#allocation2 + $0x2c0] sm:$0xff]  ;;  %v134_v34 = vld [vmem:[#allocation2 + $0x2b8] sm:$0xff]  ;;  %v117_v35 = vld [vmem:[#allocation2 + $0x230] sm:$0xff] }
  0x29   :  { %492 = vmatpush.msrb.mxu3 %v126_v0  ;;  %312 = vmatpush.msrb.mxu0 %v125_v2  ;;  %175 = vst [vmem:[#allocation1 + $0x21] ss:$4 sm:$0xff] %v34_v25  ;;  %v133_v36 = vld [vmem:[#allocation2 + $0x2b0] sm:$0xff]  ;;  %v116_v38 = vld [vmem:[#allocation2 + $0x228] sm:$0xff]  ;;  %v143_v40 = vld [vmem:[#allocation2 + $0x300] sm:$0xff] }
  0x2a   :  { %335 = vmatpush.msrb.mxu1 %v141_v4  ;;  %280 = vmatpush.msra.mxu2 %v79_v13  ;;  %177 = vst [vmem:[#allocation1 + $0x22] ss:$4 sm:$0xff] %v36_v26  ;;  %v132_v39 = vld [vmem:[#allocation2 + $0x2a8] sm:$0xff]  ;;  %v115_v41 = vld [vmem:[#allocation2 + $0x220] sm:$0xff]  ;;  %v40_v42 = vld [vmem:[%s654_s0 + $0x40] sm:$0x3f] }
  0x2b   :  { %493 = vmatpush.msrb.mxu3 %v125_v2  ;;  %313 = vmatpush.msrb.mxu0 %v124_v5  ;;  %179 = vst [vmem:[#allocation1 + $0x23] ss:$4 sm:$0xff] %v38_v29  ;;  %v42_v43 = vld [vmem:[%s654_s0 + $0x4e] sm:$0x3f]  ;;  %v44_v44 = vld [vmem:[%s654_s0 + $0x5c] sm:$0x3f] }
  0x2c   :  { %336 = vmatpush.msrb.mxu1 %v140_v6  ;;  %281 = vmatmul.f32.vlgmr.msra.gmra.mxu2 %v182_v17  ;;  %v46_v46 = vld [vmem:[%s654_s0 + $0x6a] sm:$0x3f]  ;;  %v114_v53 = vld [vmem:[#allocation2 + $0x218] sm:$0xff]  ;;  %v113_v55 = vld [vmem:[#allocation2 + $0x210] sm:$0xff] }
  0x2d   :  { %494 = vmatpush.msrb.mxu3 %v124_v5  ;;  %314 = vmatpush.msrb.mxu0 %v123_v8  ;;  %v131_v50 = vld [vmem:[#allocation2 + $0x2a0] sm:$0xff]  ;;  %v130_v54 = vld [vmem:[#allocation2 + $0x298] sm:$0xff]  ;;  %v129_v56 = vld [vmem:[#allocation2 + $0x290] sm:$0xff] }
  0x2e   :  { %337 = vmatpush.msrb.mxu1 %v139_v9  ;;  %371 = vmatpush.msrb.mxu2 %v144_v28  ;;  %v112_v57 = vld [vmem:[#allocation2 + $0x208] sm:$0xff]  ;;  %v111_v59 = vld [vmem:[#allocation2 + $0x200] sm:$0xff]  ;;  %v513_v1 = vld [vmem:[%s656_s2] ss:$0 sm:$0xff]  ;;  %s574_s2 = smov [#allocation5]  }
  0x2f   :  { %495 = vmatpush.msrb.mxu3 %v123_v8  ;;  %315 = vmatpush.msrb.mxu0 %v122_v12  ;;  %v197_v37 = vld.sshfl [vmem:[#allocation1 + $0x10] sm:$0xff pattern:$0x73625140]  ;;  %v195_v48 = vld.sshfl [vmem:[#allocation1] sm:$0xff pattern:$0x73625140] }
  0x30   :  { %338 = vmatpush.msrb.mxu1 %v138_v21  ;;  %235 = vmatmul.f32.vlgmr.msra.gmra.mxu0 %v180_v18  ;;  %v196_v51 = vld.sshfl [vmem:[#allocation1 + $0x8] sm:$0xff pattern:$0x73625140]  ;;  %v198_v52 = vld.sshfl [vmem:[#allocation1 + $0x18] sm:$0xff pattern:$0x73625140] }
  0x31   :  { %496 = vmatpush.msrb.mxu3 %v122_v12  ;;  %316 = vmatpush.msrb.mxu0 %v121_v23  ;;  %v128_v58 = vld [vmem:[#allocation2 + $0x288] sm:$0xff]  ;;  %v127_v60 = vld [vmem:[#allocation2 + $0x280] sm:$0xff]  ;;  %s470_s23 = sshll.u32 %s574_s2, 4  ;;  %s471_s23 = int_to_ptr.vmem [resolvable:$true] %s470_s23 }
  0x32   :  { %339 = vmatpush.msrb.mxu1 %v137_v24  ;;  %304 = vmatmul.f32.vlgmr.msra.gmra.mxu3 %v183_v20  ;;  %v186_v45 = vld.sshfl [vmem:[#allocation1 + $0x30] sm:$0xff pattern:$0x73625140]  ;;  %v184_v47 = vld.sshfl [vmem:[#allocation1 + $0x20] sm:$0xff pattern:$0x73625140] }
  0x33   :  { %497 = vmatpush.msrb.mxu3 %v121_v23  ;;  %317 = vmatpush.msrb.mxu0 %v120_v27  ;;  %v185_v49 = vld.sshfl [vmem:[#allocation1 + $0x28] sm:$0xff pattern:$0x73625140]  ;;  %v573_v24 = vmov 0.0  }
  0x34   :  { %340 = vmatpush.msrb.mxu1 %v136_v30  ;;  %284 = vmatmul.f32.gmra.mxu2 %v197_v37  ;;  %191 = vst [vmem:[#allocation1 + $0x20] ss:$4 sm:$0xff] %v40_v42 }
  0x35   :  { %498 = vmatpush.msrb.mxu3 %v120_v27  ;;  %318 = vmatpush.msrb.mxu0 %v119_v31  ;;  %192 = vst [vmem:[#allocation1 + $0x21] ss:$4 sm:$0xff] %v42_v43 }
  0x36   :  { %258 = vmatmul.f32.vlgmr.msra.gmra.mxu1 %v181_v19  ;;  %372 = vmatpush.msrb.mxu2 %v143_v40  ;;  %193 = vst [vmem:[#allocation1 + $0x22] ss:$4 sm:$0xff] %v44_v44 }
  0x37   :  { %499 = vmatpush.msrb.mxu3 %v119_v31  ;;  %341 = vmatpush.msrb.mxu1 %v135_v32  ;;  %194 = vst [vmem:[#allocation1 + $0x23] ss:$4 sm:$0xff] %v46_v46 }
  0x38   :  { %319 = vmatpush.msrb.mxu0 %v118_v33 }
  0x39   :  { %500 = vmatpush.msrb.mxu3 %v118_v33  ;;  %342 = vmatpush.msrb.mxu1 %v134_v34 }
  0x3a   :  { %320 = vmatpush.msrb.mxu0 %v117_v35  ;;  %307 = vmatmul.f32.gmra.mxu3 %v198_v52 }
  0x3b   :  { %501 = vmatpush.msrb.mxu3 %v117_v35  ;;  %343 = vmatpush.msrb.mxu1 %v133_v36 }
  0x3c   :  { %321 = vmatpush.msrb.mxu0 %v116_v38  ;;  %482 = vmatmul.msk.f32.vlgmr.msrb.gmra.mxu2 %vm214_vm0, %v186_v45 }
  0x3d   :  { %502 = vmatpush.msrb.mxu3 %v116_v38  ;;  %344 = vmatpush.msrb.mxu1 %v132_v39 }
  0x3e   :  { %322 = vmatpush.msrb.mxu0 %v115_v41  ;;  %261 = vmatmul.f32.gmra.mxu1 %v196_v51  ;;  %v199_v61 = vld.sshfl [vmem:[#allocation1 + $0x20] sm:$0xff pattern:$0x73625140]  ;;  %v201_v62 = vld.sshfl [vmem:[#allocation1 + $0x30] sm:$0xff pattern:$0x73625140] }
  0x3f   :  { %503 = vmatpush.msrb.mxu3 %v115_v41  ;;  %345 = vmatpush.msrb.mxu1 %v131_v50  ;;  %v200_v63 = vld.sshfl [vmem:[#allocation1 + $0x28] sm:$0xff pattern:$0x73625140] }
  0x40   :  { %238 = vmatmul.f32.gmra.mxu0 %v195_v48 }
  0x41   :  { %323 = vmatpush.msrb.mxu0 %v114_v53  ;;  %504 = vmatpush.msrb.mxu3 %v114_v53 }
  0x42   :  { %346 = vmatpush.msrb.mxu1 %v130_v54 }
  0x43   :  { %324 = vmatpush.msrb.mxu0 %v113_v55  ;;  %505 = vmatpush.msrb.mxu3 %v113_v55 }
  0x44   :  { %347 = vmatpush.msrb.mxu1 %v129_v56  ;;  %483 = vmatmul.msk.f32.gmra.mxu2 %vm214_vm0, %v201_v62 }
  0x45   :  { %325 = vmatpush.msrb.mxu0 %v112_v57  ;;  %506 = vmatpush.msrb.mxu3 %v112_v57 }
  0x46   :  { %348 = vmatpush.msrb.mxu1 %v128_v58 }
  0x47   :  { %326 = vmatpush.msrb.mxu0 %v111_v59  ;;  %507 = vmatpush.msrb.mxu3 %v111_v59 }
  0x48   :  { %349 = vmatpush.msrb.mxu1 %v127_v60  ;;  %327 = vmatmul.f32.vlgmr.msrb.gmra.mxu0 %v184_v47 }
  0x49   :  { %330 = vmatmul.f32.vlgmr.msrb.gmra.mxu3 %v199_v61  ;;  %350 = vmatmul.f32.vlgmr.msrb.gmra.mxu1 %v185_v49 }
  0x51   :  { %353 = vmatmul.f32.gmra.mxu1 %v200_v63 }
  0xad   :  { %v236_v2 = vpop.f32.mrf.mxu0 }
  0xae   :  { %v237_v4 = vadd.f32 %v513_v1, %v236_v2 }
  0xaf   :  { %v282_v3 = vpop.f32.mrf.mxu2 }
  0xb3   :  { %v259_v0 = vpop.f32.mrf.mxu1 }
  0xb4   :  { %v260_v5 = vadd.f32 %v259_v0, %v237_v4 }
  0xb5   :  { %v305_v10 = vpop.f32.mrf.mxu3 }
  0xb6   :  { %v283_v9 = vadd.f32 %v282_v3, %v260_v5 }
  0xb7   :  { %v285_v8 = vpop.f32.mrf.mxu2 }
  0xb8   :  { %v306_v11 = vadd.f32 %v305_v10, %v283_v9 }
  0xbb   :  { %v262_v7 = vpop.f32.mrf.mxu1 }
  0xbd   :  { %v239_v6 = vpop.f32.mrf.mxu0  ;;  %v308_v18 = vpop.f32.mrf.mxu3 }
  0xbe   :  { %v240_v16 = vadd.f32 %v513_v1, %v239_v6 }
  0xbf   :  { %v374_v17 = vpop.f32.mrf.mxu2 }
  0xc0   :  { %v263_v21 = vadd.f32 %v262_v7, %v240_v16 }
  0xc2   :  { %v286_v26 = vadd.f32 %v285_v8, %v263_v21  ;;  %v452_v8 = vlaneseq }
  0xc4   :  { %v309_v31 = vadd.f32 %v308_v18, %v286_v26  ;;  %v453_v10 = vand.u32 127, %v452_v8 }
  0xc5   :  { %v328_v12 = vpop.f32.mrf.mxu0 }
  0xc6   :  { %v329_v13 = vadd.f32 %v328_v12, %v306_v11  ;;  %v351_v14 = vpop.f32.mrf.mxu1  ;;  %vm454_vm9 = vcmp.lt.s32.totalorder %v453_v10, 10 }
  0xc7   :  { %v377_v41 = vpop.f32.mrf.mxu2 }
  0xc8   :  { %v352_v15 = vadd.f32 %v351_v14, %v329_v13 }
  0xca   :  { %v375_v19 = vadd.f32 %v374_v17, %v352_v15 }
  0xcc   :  { %v382_v20 = vrot.slane %v375_v19, 2  ;;  %vm399_vm1 = vcmp.gt.f32.partialorder %v375_v19, 1.0  ;;  %v403_v22 = vmul.f32 0.1, %v375_v19  ;;  %v383_v28 = vrot.slane %v375_v19, 4  ;;  %v331_v30 = vpop.f32.mrf.mxu3 }
  0xcd   :  { %v484_v25 = vsel %vm399_vm1, 1.0, %v573_v24  ;;  %v332_v34 = vadd.f32 %v331_v30, %v309_v31  ;;  %v384_v37 = vrot.slane %v375_v19, 6 }
  0xce   :  { %v404_v23 = vadd.f32 %v403_v22, %v382_v20  ;;  %v354_v36 = vpop.f32.mrf.mxu1 }
  0xcf   :  { %v355_v39 = vadd.f32 %v354_v36, %v332_v34 }
  0xd0   :  { %v405_v27 = vsub.f32 %v404_v23, %v484_v25 }
  0xd1   :  { %v378_v44 = vadd.f32 %v377_v41, %v355_v39 }
  0xd2   :  { %vm406_vm2 = vcmp.gt.f32.partialorder %v405_v27, 1.0  ;;  %v410_v29 = vmul.f32 0.1, %v405_v27 }
  0xd3   :  { %v485_v33 = vsel %vm406_vm2, 1.0, %v573_v24  ;;  %v385_v49 = vrot.slane %v378_v44, 2  ;;  %v386_v54 = vrot.slane %v378_v44, 4  ;;  %v387_v61 = vrot.slane %v378_v44, 6 }
  0xd4   :  { %v411_v32 = vadd.f32 %v410_v29, %v383_v28  ;;  %v409_v56 = vadd.f32 %v485_v33, %v484_v25 }
  0xd6   :  { %v412_v35 = vsub.f32 %v411_v32, %v485_v33 }
  0xd8   :  { %vm413_vm3 = vcmp.gt.f32.partialorder %v412_v35, 1.0  ;;  %v417_v38 = vmul.f32 0.1, %v412_v35 }
  0xd9   :  { %v486_v42 = vsel %vm413_vm3, 1.0, %v573_v24 }
  0xda   :  { %v418_v40 = vadd.f32 %v417_v38, %v384_v37  ;;  %v416_v59 = vadd.f32 %v486_v42, %v409_v56 }
  0xdc   :  { %v419_v43 = vsub.f32 %v418_v40, %v486_v42 }
  0xde   :  { %vm420_vm4 = vcmp.gt.f32.partialorder %v419_v43, 1.0  ;;  %v424_v45 = vmul.f32 0.1, %v419_v43 }
  0xdf   :  { %v487_v47 = vsel %vm420_vm4, 1.0, %v573_v24 }
  0xe0   :  { %v425_v46 = vadd.f32 %v424_v45, %v378_v44  ;;  %v423_v62 = vadd.f32 %v487_v47, %v416_v59 }
  0xe2   :  { %v426_v48 = vsub.f32 %v425_v46, %v487_v47 }
  0xe4   :  { %vm427_vm5 = vcmp.gt.f32.partialorder %v426_v48, 1.0  ;;  %v431_v50 = vmul.f32 0.1, %v426_v48 }
  0xe5   :  { %v488_v52 = vsel %vm427_vm5, 1.0, %v573_v24 }
  0xe6   :  { %v432_v51 = vadd.f32 %v431_v50, %v385_v49  ;;  %v430_v0 = vadd.f32 %v488_v52, %v423_v62 }
  0xe8   :  { %v433_v53 = vsub.f32 %v432_v51, %v488_v52 }
  0xea   :  { %vm434_vm6 = vcmp.gt.f32.partialorder %v433_v53, 1.0  ;;  %v438_v55 = vmul.f32 0.1, %v433_v53 }
  0xeb   :  { %v489_v58 = vsel %vm434_vm6, 1.0, %v573_v24 }
  0xec   :  { %v439_v57 = vadd.f32 %v438_v55, %v386_v54  ;;  %v437_v3 = vadd.f32 %v489_v58, %v430_v0 }
  0xee   :  { %v440_v60 = vsub.f32 %v439_v57, %v489_v58 }
  0xf0   :  { %v445_v63 = vmul.f32 0.1, %v440_v60  ;;  %vm441_vm7 = vcmp.gt.f32.partialorder %v440_v60, 1.0 }
  0xf1   :  { %v490_v2 = vsel %vm441_vm7, 1.0, %v573_v24 }
  0xf2   :  { %v446_v1 = vadd.f32 %v445_v63, %v387_v61  ;;  %v444_v5 = vadd.f32 %v490_v2, %v437_v3 }
  0xf4   :  { %v447_v4 = vsub.f32 %v446_v1, %v490_v2 }
  0xf6   :  { %vm448_vm8 = vcmp.gt.f32.partialorder %v447_v4, 1.0 }
  0xf7   :  { %v491_v6 = vsel %vm448_vm8, 1.0, %v573_v24 }
  0xf8   :  { %v451_v7 = vadd.f32 %v491_v6, %v444_v5 }
  0xfa   :  { %v455_v9 = vmul.f32 1.442695, %v451_v7 }
  0xfc   :  { %514 = vpow2.f32 %v455_v9 }
 0x102   :  { %v515_v11 = vpop.eup %514 }
 0x103   :  { %v457_v12 = vsel %vm454_vm9, %v515_v11, 0.0 }
 0x104   :  { %v459_v13 = vsel %vm458_vm10, %v457_v12, 0.0 }
 0x105   :  { %460 = vadd.xlane.f32.xlu0 %v459_v13 }
 0x178   :  { %v461_v14 = vpop.xlane.xlu0 %460 }
 0x179   :  { %516 = vrcp.f32 %v461_v14 }
 0x17f   :  { %v517_v15 = vpop.eup %516 }
 0x180   :  { %v463_v16 = vmul.f32 %v517_v15, %v457_v12 }
 0x182   :  { %464 = vst [vmem:[#allocation5] sm:$0x3] %v463_v16 }
 0x183   :  { %475 = dma.vmem_to_hbm [thread:$0]  %s471_s23, 32, %s473_s26, [#allocation4]  }
 0x184   :  { %568 = dma.done.wait [#allocation4], 32  }
 0x185   :  { %569 = vsyncadd [#allocation4], 4294967264 }
 0x186   :  { %480 = vsyncpa [#allocation3], 1 }
 0x187   :  { %481 = vsyncpa [#allocation4], 1 }

</bundles_post_ra>
